<compile_context>
chip_gen: v6e
topology: v6e:2x2x1
jax: 0.10.0
libtpu: 0.0.40
codegen_flags: <defaults>
</compile_context>

<pallas_src>
import functools

import jax
import jax.numpy as jnp
import numpy as np
from jax import lax
from jax.experimental import pallas as pl
from jax.experimental.pallas import tpu as pltpu

EPS = 1e-5
LANE = 128


def _round_up(x, m):
    return (x + m - 1) // m * m


def _pad2d(a, rows, cols):
    r, c = a.shape
    return jnp.pad(a, ((0, rows - r), (0, cols - c)))


def _pick_tile_m(m, dh, dl):
    """Largest row tile that divides M, fits a conservative per-tile VMEM
    budget (so it also works on v7x's 64 MiB VMEM with double buffering) and
    leaves >=2 grid steps when possible so the pipeline actually overlaps."""
    bytes_per_row = 4 * (dh + 4 * dl)          # x_h + x_l + theta/phi/g tiles
    cap = max(8, (8 * 1024 * 1024) // (2 * bytes_per_row))
    for t in (1024, 512, 256, 128, 64, 32, 16, 8):
        if t <= cap and m % t == 0 and m // t >= 2:
            return t
    return m                                   # tiny M: single full-size tile


# --------------------------------------------------------------------------
# Kernel A: fused input projections  theta = xh@Wt+bt, phi = xl@Wp+bp, g = xl@Wg+bg
# --------------------------------------------------------------------------
def _proj_kernel(xh_ref, xl_ref, wt_ref, bt_ref, wp_ref, bp_ref, wg_ref, bg_ref,
                 theta_ref, phi_ref, g_ref):
    xh = xh_ref[...]
    xl = xl_ref[...]
    theta = jnp.dot(xh, wt_ref[...], preferred_element_type=jnp.float32) + bt_ref[...]
    phi = jnp.dot(xl, wp_ref[...], preferred_element_type=jnp.float32) + bp_ref[...]
    g = jnp.dot(xl, wg_ref[...], preferred_element_type=jnp.float32) + bg_ref[...]
    theta_ref[...] = theta.astype(theta_ref.dtype)
    phi_ref[...] = phi.astype(phi_ref.dtype)
    g_ref[...] = g.astype(g_ref.dtype)


# --------------------------------------------------------------------------
# Kernel B: y = (theta @ phi^T / M) @ g, streamed over key tiles.
# The (M, M) energy matrix only ever exists as a (tm, tk) vreg tile.
# --------------------------------------------------------------------------
def _attn_kernel(theta_ref, phi_ref, g_ref, y_ref, acc_ref, *, inv_m):
    ki = pl.program_id(1)

    @pl.when(ki == 0)
    def _():
        acc_ref[...] = jnp.zeros_like(acc_ref)

    # energy tile (tm_q, tm_k): contract both (padded) low_dim lane axes.
    energy = lax.dot_general(theta_ref[...], phi_ref[...],
                             (((1,), (1,)), ((), ())),
                             preferred_element_type=jnp.float32)
    acc_ref[...] += jnp.dot(energy.astype(g_ref.dtype), g_ref[...],
                            preferred_element_type=jnp.float32)

    @pl.when(ki == pl.num_programs(1) - 1)
    def _():
        # attention = energy / M  folded into the finalize (scale after sum).
        y_ref[...] = (acc_ref[...] * inv_m).astype(y_ref.dtype)


# --------------------------------------------------------------------------
# Kernel C: W_y = y @ Ww + bw, plus pass-1 of BatchNorm (per-feature sum and
# sum-of-squares accumulated across M tiles; mean / rstd finalized on the last
# grid step).  Grid axis must be sequential ("arbitrary").
# --------------------------------------------------------------------------
def _wlinear_stats_kernel(y_ref, ww_ref, bw_ref, wy_ref, mean_ref, rstd_ref, *,
                          inv_m, eps):
    i = pl.program_id(0)

    @pl.when(i == 0)
    def _():
        mean_ref[...] = jnp.zeros_like(mean_ref)
        rstd_ref[...] = jnp.zeros_like(rstd_ref)

    wy = jnp.dot(y_ref[...], ww_ref[...], preferred_element_type=jnp.float32) + bw_ref[...]
    wy_ref[...] = wy
    mean_ref[...] += jnp.sum(wy, axis=0, keepdims=True)            # running sum
    rstd_ref[...] += jnp.sum(wy * wy, axis=0, keepdims=True)       # running sum of squares

    @pl.when(i == pl.num_programs(0) - 1)
    def _():
        mean = mean_ref[...] * inv_m
        var = jnp.maximum(rstd_ref[...] * inv_m - mean * mean, 0.0)
        mean_ref[...] = mean
        rstd_ref[...] = lax.rsqrt(var + eps)


# --------------------------------------------------------------------------
# Kernel D: pass-2 of BatchNorm (normalize + affine) + residual add, parallel.
# --------------------------------------------------------------------------
def _bn_residual_kernel(wy_ref, xh_ref, mean_ref, rstd_ref, gamma_ref, beta_ref,
                        z_ref):
    xhat = (wy_ref[...] - mean_ref[...]) * rstd_ref[...]
    z_ref[...] = (xhat * gamma_ref[...] + beta_ref[...] + xh_ref[...]).astype(z_ref.dtype)


# --------------------------------------------------------------------------
# Wrapper
# --------------------------------------------------------------------------
@functools.partial(jax.jit, static_argnames=("matmul_dtype",))
def mfa_block_forward(x_h, x_l, params, *, matmul_dtype=jnp.float32):
    """MFA_block forward. x_h: (B, N, high_dim), x_l: (B, N, low_dim).

    params (PyTorch layout):
      w_g/b_g, w_theta/b_theta, w_phi/b_phi : Linear weights (out, in) / (out,)
      w_W/b_W                               : Linear(low_dim -> high_dim)
      gamma/beta                            : BatchNorm1d(high_dim) affine

    matmul_dtype=jnp.bfloat16 halves MXU-operand bytes and doubles MXU
    throughput on v6e/v7x; all BN / residual math stays f32 either way.
    """
    B, N, dh_true = x_h.shape
    _, _, dl_true = x_l.shape
    M = B * N

    dh = _round_up(dh_true, LANE)
    dl = _round_up(dl_true, LANE)
    tm = _pick_tile_m(M, dh, dl)
    n_m = M // tm
    inv_m = 1.0 / float(M)
    md = matmul_dtype
    f32 = jnp.float32

    # ---- glue: flatten rows, zero-pad feature axes to lane multiples --------
    xh2 = _pad2d(x_h.reshape(M, dh_true).astype(f32), M, dh)   # f32 residual path
    xl2 = _pad2d(x_l.reshape(M, dl_true).astype(f32), M, dl)

    # Weights in (in_features, out_features) layout, zero-padded.
    wt = _pad2d(params["w_theta"].T.astype(f32), dh, dl)
    wp = _pad2d(params["w_phi"].T.astype(f32), dl, dl)
    wg = _pad2d(params["w_g"].T.astype(f32), dl, dl)
    ww = _pad2d(params["w_W"].T.astype(f32), dl, dh)
    bt = _pad2d(params["b_theta"].astype(f32).reshape(1, -1), 1, dl)
    bp = _pad2d(params["b_phi"].astype(f32).reshape(1, -1), 1, dl)
    bg = _pad2d(params["b_g"].astype(f32).reshape(1, -1), 1, dl)
    bw = _pad2d(params["b_W"].astype(f32).reshape(1, -1), 1, dh)
    gamma = _pad2d(params["gamma"].astype(f32).reshape(1, -1), 1, dh)
    beta = _pad2d(params["beta"].astype(f32).reshape(1, -1), 1, dh)

    # MXU operands (optionally bf16); biases / BN params stay f32.
    xh_mm = xh2.astype(md)
    xl_mm = xl2.astype(md)
    wt_mm, wp_mm, wg_mm, ww_mm = (wt.astype(md), wp.astype(md),
                                  wg.astype(md), ww.astype(md))

    def _bcast_spec(shape):      # small array re-used by every 1-D grid step
        return pl.BlockSpec(shape, lambda i: (0, 0))

    # ---- Kernel A: projections (grid over M rows, parallel) -----------------
    theta_x, phi_x, g_x = pl.pallas_call(
        _proj_kernel,
        grid=(n_m,),
        in_specs=[pl.BlockSpec((tm, dh), lambda i: (i, 0)),
                  pl.BlockSpec((tm, dl), lambda i: (i, 0)),
                  _bcast_spec((dh, dl)), _bcast_spec((1, dl)),
                  _bcast_spec((dl, dl)), _bcast_spec((1, dl)),
                  _bcast_spec((dl, dl)), _bcast_spec((1, dl))],
        out_specs=[pl.BlockSpec((tm, dl), lambda i: (i, 0)),
                   pl.BlockSpec((tm, dl), lambda i: (i, 0)),
                   pl.BlockSpec((tm, dl), lambda i: (i, 0))],
        out_shape=[jax.ShapeDtypeStruct((M, dl), md)] * 3,
        compiler_params=pltpu.CompilerParams(
            dimension_semantics=("parallel",)),
    )(xh_mm, xl_mm, wt_mm, bt, wp_mm, bp, wg_mm, bg)

    # ---- Kernel B: attention-weighted y (query tiles parallel, key tiles seq)
    y = pl.pallas_call(
        functools.partial(_attn_kernel, inv_m=inv_m),
        grid=(n_m, n_m),
        in_specs=[pl.BlockSpec((tm, dl), lambda qi, ki: (qi, 0)),
                  pl.BlockSpec((tm, dl), lambda qi, ki: (ki, 0)),
                  pl.BlockSpec((tm, dl), lambda qi, ki: (ki, 0))],
        out_specs=pl.BlockSpec((tm, dl), lambda qi, ki: (qi, 0)),
        out_shape=jax.ShapeDtypeStruct((M, dl), md),
        scratch_shapes=[pltpu.VMEM((tm, dl), jnp.float32)],
        compiler_params=pltpu.CompilerParams(
            dimension_semantics=("parallel", "arbitrary")),
    )(theta_x, phi_x, g_x)

    # ---- Kernel C: W linear + BN statistics accumulation (sequential) -------
    wy, mean, rstd = pl.pallas_call(
        functools.partial(_wlinear_stats_kernel, inv_m=inv_m, eps=EPS),
        grid=(n_m,),
        in_specs=[pl.BlockSpec((tm, dl), lambda i: (i, 0)),
                  _bcast_spec((dl, dh)), _bcast_spec((1, dh))],
        out_specs=[pl.BlockSpec((tm, dh), lambda i: (i, 0)),
                   _bcast_spec((1, dh)), _bcast_spec((1, dh))],
        out_shape=[jax.ShapeDtypeStruct((M, dh), jnp.float32),
                   jax.ShapeDtypeStruct((1, dh), jnp.float32),
                   jax.ShapeDtypeStruct((1, dh), jnp.float32)],
        compiler_params=pltpu.CompilerParams(
            dimension_semantics=("arbitrary",)),
    )(y, ww_mm, bw)

    # ---- Kernel D: normalize + affine + residual (parallel) -----------------
    z = pl.pallas_call(
        _bn_residual_kernel,
        grid=(n_m,),
        in_specs=[pl.BlockSpec((tm, dh), lambda i: (i, 0)),
                  pl.BlockSpec((tm, dh), lambda i: (i, 0)),
                  _bcast_spec((1, dh)), _bcast_spec((1, dh)),
                  _bcast_spec((1, dh)), _bcast_spec((1, dh))],
        out_specs=pl.BlockSpec((tm, dh), lambda i: (i, 0)),
        out_shape=jax.ShapeDtypeStruct((M, dh), jnp.float32),
        compiler_params=pltpu.CompilerParams(
            dimension_semantics=("parallel",)),
    )(wy, xh2, mean, rstd, gamma, beta)

    return z[:, :dh_true].reshape(B, N, dh_true).astype(x_h.dtype)


# --------------------------------------------------------------------------
# Pure-JAX reference with identical semantics (correctness check)
# --------------------------------------------------------------------------
def _reference(x_h, x_l, p):
    B, N, dh = x_h.shape
    hp = lax.Precision.HIGHEST
    mm = functools.partial(jnp.matmul, precision=hp)
    xh = x_h.reshape(B * N, dh).astype(jnp.float32)
    xl = x_l.reshape(B * N, -1).astype(jnp.float32)
    g_x = mm(xl, p["w_g"].T) + p["b_g"]
    theta_x = mm(xh, p["w_theta"].T) + p["b_theta"]
    phi_x = mm(xl, p["w_phi"].T) + p["b_phi"]
    energy = mm(theta_x, phi_x.T)
    attention = energy / energy.shape[-1]
    y = mm(attention, g_x)
    wy = mm(y, p["w_W"].T) + p["b_W"]
    mean = wy.mean(axis=0, keepdims=True)
    var = ((wy - mean) ** 2).mean(axis=0, keepdims=True)
    wy_bn = (wy - mean) / jnp.sqrt(var + EPS) * p["gamma"] + p["beta"]
    return (wy_bn + xh).reshape(B, N, dh)


if __name__ == "__main__":
    # Small shapes consistent with the module: B=2, N=8, high_dim=32, low_dim=16.
    B, N = 2, 8
    high_dim, low_dim = 32, 16

    key = jax.random.PRNGKey(0)
    ks = jax.random.split(key, 12)

    def linear_init(kw, kb, out_f, in_f):
        w = jax.random.normal(kw, (out_f, in_f), jnp.float32) / np.sqrt(in_f)
        b = 0.1 * jax.random.normal(kb, (out_f,), jnp.float32)
        return w, b

    w_g, b_g = linear_init(ks[0], ks[1], low_dim, low_dim)
    w_theta, b_theta = linear_init(ks[2], ks[3], low_dim, high_dim)
    w_phi, b_phi = linear_init(ks[4], ks[5], low_dim, low_dim)
    w_W, b_W = linear_init(ks[6], ks[7], high_dim, low_dim)
    # NOTE: the module constructor zero-inits the BN affine (making W_y vanish
    # and z == x_h); use non-trivial gamma/beta so the full path is exercised.
    gamma = 1.0 + 0.1 * jax.random.normal(ks[8], (high_dim,), jnp.float32)
    beta = 0.1 * jax.random.normal(ks[9], (high_dim,), jnp.float32)

    x_h = jax.random.normal(ks[10], (B, N, high_dim), jnp.float32)
    x_l = jax.random.normal(ks[11], (B, N, low_dim), jnp.float32)

    params = dict(w_g=w_g, b_g=b_g, w_theta=w_theta, b_theta=b_theta,
                  w_phi=w_phi, b_phi=b_phi, w_W=w_W, b_W=b_W,
                  gamma=gamma, beta=beta)

    # f32 MXU operands for the tight check; use matmul_dtype=jnp.bfloat16 on
    # v6e/v7x for 2x MXU throughput / half the operand DMA bytes.
    z = mfa_block_forward(x_h, x_l, params, matmul_dtype=jnp.float32)
    z = jax.block_until_ready(z)

    ref = _reference(x_h, x_l, params)
    np.testing.assert_allclose(np.asarray(z), np.asarray(ref), rtol=1e-2, atol=1e-2)

    print("KERNEL_OK")
</pallas_src>

<mosaic_0001>
module attributes {stable_mosaic.version = 11 : i64} {
  func.func @_wlinear_stats_kernel(%arg0: i32, %arg1: memref<8x128xf32, #tpu.memory_space<vmem>>, %arg2: memref<128x128xf32, #tpu.memory_space<vmem>>, %arg3: memref<1x128xf32, #tpu.memory_space<vmem>>, %arg4: memref<8x128xf32, #tpu.memory_space<vmem>>, %arg5: memref<1x128xf32, #tpu.memory_space<vmem>>, %arg6: memref<1x128xf32, #tpu.memory_space<vmem>>) attributes {dimension_semantics = [#tpu.dimension_semantics<arbitrary>], iteration_bounds = array<i64: 2>, scalar_prefetch = 0 : i64, scratch_operands = 0 : i64, tpu.core_type = #tpu.core_type<tc>, window_params = [{transform_indices = @transform_0, window_bounds = array<i64: 8, 128>}, {pipeline_mode = #tpu.pipeline_mode<synchronous>, transform_indices = @transform_1, window_bounds = array<i64: 128, 128>}, {pipeline_mode = #tpu.pipeline_mode<synchronous>, transform_indices = @transform_2, window_bounds = array<i64: 1, 128>}, {transform_indices = @transform_3, window_bounds = array<i64: 8, 128>}, {pipeline_mode = #tpu.pipeline_mode<synchronous>, transform_indices = @transform_4, window_bounds = array<i64: 1, 128>}, {pipeline_mode = #tpu.pipeline_mode<synchronous>, transform_indices = @transform_5, window_bounds = array<i64: 1, 128>}]} {
    %c0_i32 = arith.constant 0 : i32
    %0 = arith.cmpi eq, %arg0, %c0_i32 : i32
    %1 = arith.extui %0 : i1 to i32
    %c0_i32_0 = arith.constant 0 : i32
    %2 = arith.cmpi ne, %1, %c0_i32_0 : i32
    scf.if %2 {
      %cst_19 = arith.constant 0.000000e+00 : f32
      %24 = vector.broadcast %cst_19 : f32 to vector<1x128xf32>
      %c0_20 = arith.constant 0 : index
      %c0_21 = arith.constant 0 : index
      %25 = vector.load %arg5[%c0_20, %c0_21] : memref<1x128xf32, #tpu.memory_space<vmem>>, vector<1x128xf32>
      tpu.vector_store %arg5[%c0_20, %c0_21], %24 {strides = array<i32>} : memref<1x128xf32, #tpu.memory_space<vmem>>, vector<1x128xf32>,
      %cst_22 = arith.constant 0.000000e+00 : f32
      %26 = vector.broadcast %cst_22 : f32 to vector<1x128xf32>
      %c0_23 = arith.constant 0 : index
      %c0_24 = arith.constant 0 : index
      %27 = vector.load %arg6[%c0_23, %c0_24] : memref<1x128xf32, #tpu.memory_space<vmem>>, vector<1x128xf32>
      tpu.vector_store %arg6[%c0_23, %c0_24], %26 {strides = array<i32>} : memref<1x128xf32, #tpu.memory_space<vmem>>, vector<1x128xf32>,
    } else {
    }
    %c0 = arith.constant 0 : index
    %c0_1 = arith.constant 0 : index
    %3 = vector.load %arg1[%c0, %c0_1] : memref<8x128xf32, #tpu.memory_space<vmem>>, vector<8x128xf32>
    %c0_2 = arith.constant 0 : index
    %c0_3 = arith.constant 0 : index
    %4 = vector.load %arg2[%c0_2, %c0_3] : memref<128x128xf32, #tpu.memory_space<vmem>>, vector<128x128xf32>
    %cst = arith.constant dense<0.000000e+00> : vector<8x128xf32>
    %5 = tpu.matmul %3, %4, %cst {dimension_numbers = #tpu.dot_dimension_numbers<[1], [0], [0], [1], [0, 0, 1, 1], [], []>} : vector<8x128xf32>, vector<128x128xf32>, vector<8x128xf32> -> vector<8x128xf32>
    %c0_4 = arith.constant 0 : index
    %c0_5 = arith.constant 0 : index
    %6 = vector.load %arg3[%c0_4, %c0_5] : memref<1x128xf32, #tpu.memory_space<vmem>>, vector<1x128xf32>
    %7 = vector.broadcast %6 : vector<1x128xf32> to vector<8x128xf32>
    %8 = arith.addf %5, %7 : vector<8x128xf32>
    %c0_6 = arith.constant 0 : index
    %c0_7 = arith.constant 0 : index
    %9 = vector.load %arg4[%c0_6, %c0_7] : memref<8x128xf32, #tpu.memory_space<vmem>>, vector<8x128xf32>
    tpu.vector_store %arg4[%c0_6, %c0_7], %8 {strides = array<i32>} : memref<8x128xf32, #tpu.memory_space<vmem>>, vector<8x128xf32>,
    %c0_8 = arith.constant 0 : index
    %c0_9 = arith.constant 0 : index
    %10 = vector.load %arg5[%c0_8, %c0_9] : memref<1x128xf32, #tpu.memory_space<vmem>>, vector<1x128xf32>
    %cst_10 = arith.constant dense<0.000000e+00> : vector<128xf32>
    %11 = vector.multi_reduction <add>, %8, %cst_10 [0] : vector<8x128xf32> to vector<128xf32>
    %12 = vector.shape_cast %11 : vector<128xf32> to vector<1x128xf32>
    %13 = arith.addf %10, %12 : vector<1x128xf32>
    %c0_11 = arith.constant 0 : index
    %c0_12 = arith.constant 0 : index
    %14 = vector.load %arg5[%c0_11, %c0_12] : memref<1x128xf32, #tpu.memory_space<vmem>>, vector<1x128xf32>
    tpu.vector_store %arg5[%c0_11, %c0_12], %13 {strides = array<i32>} : memref<1x128xf32, #tpu.memory_space<vmem>>, vector<1x128xf32>,
    %c0_13 = arith.constant 0 : index
    %c0_14 = arith.constant 0 : index
    %15 = vector.load %arg6[%c0_13, %c0_14] : memref<1x128xf32, #tpu.memory_space<vmem>>, vector<1x128xf32>
    %16 = arith.mulf %8, %8 : vector<8x128xf32>
    %cst_15 = arith.constant dense<0.000000e+00> : vector<128xf32>
    %17 = vector.multi_reduction <add>, %16, %cst_15 [0] : vector<8x128xf32> to vector<128xf32>
    %18 = vector.shape_cast %17 : vector<128xf32> to vector<1x128xf32>
    %19 = arith.addf %15, %18 : vector<1x128xf32>
    %c0_16 = arith.constant 0 : index
    %c0_17 = arith.constant 0 : index
    %20 = vector.load %arg6[%c0_16, %c0_17] : memref<1x128xf32, #tpu.memory_space<vmem>>, vector<1x128xf32>
    tpu.vector_store %arg6[%c0_16, %c0_17], %19 {strides = array<i32>} : memref<1x128xf32, #tpu.memory_space<vmem>>, vector<1x128xf32>,
    %c1_i32 = arith.constant 1 : i32
    %21 = arith.cmpi eq, %arg0, %c1_i32 : i32
    %22 = arith.extui %21 : i1 to i32
    %c0_i32_18 = arith.constant 0 : i32
    %23 = arith.cmpi ne, %22, %c0_i32_18 : i32
    scf.if %23 {
      %c0_19 = arith.constant 0 : index
      %c0_20 = arith.constant 0 : index
      %24 = vector.load %arg5[%c0_19, %c0_20] : memref<1x128xf32, #tpu.memory_space<vmem>>, vector<1x128xf32>
      %cst_21 = arith.constant 6.250000e-02 : f32
      %25 = vector.broadcast %cst_21 : f32 to vector<1x128xf32>
      %26 = arith.mulf %24, %25 : vector<1x128xf32>
      %c0_22 = arith.constant 0 : index
      %c0_23 = arith.constant 0 : index
      %27 = vector.load %arg6[%c0_22, %c0_23] : memref<1x128xf32, #tpu.memory_space<vmem>>, vector<1x128xf32>
      %cst_24 = arith.constant 6.250000e-02 : f32
      %28 = vector.broadcast %cst_24 : f32 to vector<1x128xf32>
      %29 = arith.mulf %27, %28 : vector<1x128xf32>
      %30 = arith.mulf %26, %26 : vector<1x128xf32>
      %31 = arith.subf %29, %30 : vector<1x128xf32>
      %cst_25 = arith.constant 0.000000e+00 : f32
      %32 = vector.broadcast %cst_25 : f32 to vector<1x128xf32>
      %33 = arith.maximumf %31, %32 : vector<1x128xf32>
      %c0_26 = arith.constant 0 : index
      %c0_27 = arith.constant 0 : index
      %34 = vector.load %arg5[%c0_26, %c0_27] : memref<1x128xf32, #tpu.memory_space<vmem>>, vector<1x128xf32>
      tpu.vector_store %arg5[%c0_26, %c0_27], %26 {strides = array<i32>} : memref<1x128xf32, #tpu.memory_space<vmem>>, vector<1x128xf32>,
      %cst_28 = arith.constant 9.99999974E-6 : f32
      %35 = vector.broadcast %cst_28 : f32 to vector<1x128xf32>
      %36 = arith.addf %33, %35 : vector<1x128xf32>
      %37 = math.rsqrt %36 : vector<1x128xf32>
      %c0_29 = arith.constant 0 : index
      %c0_30 = arith.constant 0 : index
      %38 = vector.load %arg6[%c0_29, %c0_30] : memref<1x128xf32, #tpu.memory_space<vmem>>, vector<1x128xf32>
      tpu.vector_store %arg6[%c0_29, %c0_30], %37 {strides = array<i32>} : memref<1x128xf32, #tpu.memory_space<vmem>>, vector<1x128xf32>,
    } else {
    }
    return
  }
  func.func @transform_0(%arg0: i32) -> (i32, i32) {
    %c0_i32 = arith.constant 0 : i32
    %c0_i32_0 = arith.constant 0 : i32
    return %arg0, %c0_i32 : i32, i32
  }
  func.func @transform_1(%arg0: i32) -> (i32, i32) {
    %c0_i32 = arith.constant 0 : i32
    %c0_i32_0 = arith.constant 0 : i32
    %c0_i32_1 = arith.constant 0 : i32
    return %c0_i32, %c0_i32_0 : i32, i32
  }
  func.func @transform_2(%arg0: i32) -> (i32, i32) {
    %c0_i32 = arith.constant 0 : i32
    %c0_i32_0 = arith.constant 0 : i32
    %c0_i32_1 = arith.constant 0 : i32
    return %c0_i32, %c0_i32_0 : i32, i32
  }
  func.func @transform_3(%arg0: i32) -> (i32, i32) {
    %c0_i32 = arith.constant 0 : i32
    %c0_i32_0 = arith.constant 0 : i32
    return %arg0, %c0_i32 : i32, i32
  }
  func.func @transform_4(%arg0: i32) -> (i32, i32) {
    %c0_i32 = arith.constant 0 : i32
    %c0_i32_0 = arith.constant 0 : i32
    %c0_i32_1 = arith.constant 0 : i32
    return %c0_i32, %c0_i32_0 : i32, i32
  }
  func.func @transform_5(%arg0: i32) -> (i32, i32) {
    %c0_i32 = arith.constant 0 : i32
    %c0_i32_0 = arith.constant 0 : i32
    %c0_i32_1 = arith.constant 0 : i32
    return %c0_i32, %c0_i32_0 : i32, i32
  }
}

module attributes {stable_mosaic.version = 11 : i64} {
  func.func @_attn_kernel(%arg0: i32, %arg1: i32, %arg2: memref<8x128xf32, #tpu.memory_space<vmem>>, %arg3: memref<8x128xf32, #tpu.memory_space<vmem>>, %arg4: memref<8x128xf32, #tpu.memory_space<vmem>>, %arg5: memref<8x128xf32, #tpu.memory_space<vmem>>, %arg6: memref<8x128xf32, #tpu.memory_space<vmem>>) attributes {dimension_semantics = [#tpu.dimension_semantics<parallel>, #tpu.dimension_semantics<arbitrary>], iteration_bounds = array<i64: 2, 2>, scalar_prefetch = 0 : i64, scratch_operands = 1 : i64, tpu.core_type = #tpu.core_type<tc>, window_params = [{transform_indices = @transform_0, window_bounds = array<i64: 8, 128>}, {transform_indices = @transform_1, window_bounds = array<i64: 8, 128>}, {transform_indices = @transform_2, window_bounds = array<i64: 8, 128>}, {transform_indices = @transform_3, window_bounds = array<i64: 8, 128>}]} {
    %c0_i32 = arith.constant 0 : i32
    %0 = arith.cmpi eq, %arg1, %c0_i32 : i32
    %1 = arith.extui %0 : i1 to i32
    %c0_i32_0 = arith.constant 0 : i32
    %2 = arith.cmpi ne, %1, %c0_i32_0 : i32
    scf.if %2 {
      %cst_12 = arith.constant 0.000000e+00 : f32
      %14 = vector.broadcast %cst_12 : f32 to vector<8x128xf32>
      %c0_13 = arith.constant 0 : index
      %c0_14 = arith.constant 0 : index
      %15 = vector.load %arg6[%c0_13, %c0_14] : memref<8x128xf32, #tpu.memory_space<vmem>>, vector<8x128xf32>
      tpu.vector_store %arg6[%c0_13, %c0_14], %14 {strides = array<i32>} : memref<8x128xf32, #tpu.memory_space<vmem>>, vector<8x128xf32>,
    } else {
    }
    %c0 = arith.constant 0 : index
    %c0_1 = arith.constant 0 : index
    %3 = vector.load %arg2[%c0, %c0_1] : memref<8x128xf32, #tpu.memory_space<vmem>>, vector<8x128xf32>
    %c0_2 = arith.constant 0 : index
    %c0_3 = arith.constant 0 : index
    %4 = vector.load %arg3[%c0_2, %c0_3] : memref<8x128xf32, #tpu.memory_space<vmem>>, vector<8x128xf32>
    %cst = arith.constant dense<0.000000e+00> : vector<8x8xf32>
    %5 = tpu.matmul %3, %4, %cst {dimension_numbers = #tpu.dot_dimension_numbers<[1], [1], [0], [0], [0, 0, 1, 0], [], []>} : vector<8x128xf32>, vector<8x128xf32>, vector<8x8xf32> -> vector<8x8xf32>
    %c0_4 = arith.constant 0 : index
    %c0_5 = arith.constant 0 : index
    %6 = vector.load %arg6[%c0_4, %c0_5] : memref<8x128xf32, #tpu.memory_space<vmem>>, vector<8x128xf32>
    %c0_6 = arith.constant 0 : index
    %c0_7 = arith.constant 0 : index
    %7 = vector.load %arg4[%c0_6, %c0_7] : memref<8x128xf32, #tpu.memory_space<vmem>>, vector<8x128xf32>
    %cst_8 = arith.constant dense<0.000000e+00> : vector<8x128xf32>
    %8 = tpu.matmul %5, %7, %cst_8 {dimension_numbers = #tpu.dot_dimension_numbers<[1], [0], [0], [1], [0, 0, 1, 1], [], []>} : vector<8x8xf32>, vector<8x128xf32>, vector<8x128xf32> -> vector<8x128xf32>
    %9 = arith.addf %6, %8 : vector<8x128xf32>
    %c0_9 = arith.constant 0 : index
    %c0_10 = arith.constant 0 : index
    %10 = vector.load %arg6[%c0_9, %c0_10] : memref<8x128xf32, #tpu.memory_space<vmem>>, vector<8x128xf32>
    tpu.vector_store %arg6[%c0_9, %c0_10], %9 {strides = array<i32>} : memref<8x128xf32, #tpu.memory_space<vmem>>, vector<8x128xf32>,
    %c1_i32 = arith.constant 1 : i32
    %11 = arith.cmpi eq, %arg1, %c1_i32 : i32
    %12 = arith.extui %11 : i1 to i32
    %c0_i32_11 = arith.constant 0 : i32
    %13 = arith.cmpi ne, %12, %c0_i32_11 : i32
    scf.if %13 {
      %c0_12 = arith.constant 0 : index
      %c0_13 = arith.constant 0 : index
      %14 = vector.load %arg6[%c0_12, %c0_13] : memref<8x128xf32, #tpu.memory_space<vmem>>, vector<8x128xf32>
      %cst_14 = arith.constant 6.250000e-02 : f32
      %15 = vector.broadcast %cst_14 : f32 to vector<8x128xf32>
      %16 = arith.mulf %14, %15 : vector<8x128xf32>
      %c0_15 = arith.constant 0 : index
      %c0_16 = arith.constant 0 : index
      %17 = vector.load %arg5[%c0_15, %c0_16] : memref<8x128xf32, #tpu.memory_space<vmem>>, vector<8x128xf32>
      tpu.vector_store %arg5[%c0_15, %c0_16], %16 {strides = array<i32>} : memref<8x128xf32, #tpu.memory_space<vmem>>, vector<8x128xf32>,
    } else {
    }
    return
  }
  func.func @transform_0(%arg0: i32, %arg1: i32) -> (i32, i32) {
    %c0_i32 = arith.constant 0 : i32
    %c0_i32_0 = arith.constant 0 : i32
    return %arg0, %c0_i32 : i32, i32
  }
  func.func @transform_1(%arg0: i32, %arg1: i32) -> (i32, i32) {
    %c0_i32 = arith.constant 0 : i32
    %c0_i32_0 = arith.constant 0 : i32
    return %arg1, %c0_i32 : i32, i32
  }
  func.func @transform_2(%arg0: i32, %arg1: i32) -> (i32, i32) {
    %c0_i32 = arith.constant 0 : i32
    %c0_i32_0 = arith.constant 0 : i32
    return %arg1, %c0_i32 : i32, i32
  }
  func.func @transform_3(%arg0: i32, %arg1: i32) -> (i32, i32) {
    %c0_i32 = arith.constant 0 : i32
    %c0_i32_0 = arith.constant 0 : i32
    return %arg0, %c0_i32 : i32, i32
  }
}

module attributes {stable_mosaic.version = 11 : i64} {
  func.func @_bn_residual_kernel(%arg0: i32, %arg1: memref<8x128xf32, #tpu.memory_space<vmem>>, %arg2: memref<8x128xf32, #tpu.memory_space<vmem>>, %arg3: memref<1x128xf32, #tpu.memory_space<vmem>>, %arg4: memref<1x128xf32, #tpu.memory_space<vmem>>, %arg5: memref<1x128xf32, #tpu.memory_space<vmem>>, %arg6: memref<1x128xf32, #tpu.memory_space<vmem>>, %arg7: memref<8x128xf32, #tpu.memory_space<vmem>>) attributes {dimension_semantics = [#tpu.dimension_semantics<parallel>], iteration_bounds = array<i64: 2>, scalar_prefetch = 0 : i64, scratch_operands = 0 : i64, tpu.core_type = #tpu.core_type<tc>, window_params = [{transform_indices = @transform_0, window_bounds = array<i64: 8, 128>}, {transform_indices = @transform_1, window_bounds = array<i64: 8, 128>}, {pipeline_mode = #tpu.pipeline_mode<synchronous>, transform_indices = @transform_2, window_bounds = array<i64: 1, 128>}, {pipeline_mode = #tpu.pipeline_mode<synchronous>, transform_indices = @transform_3, window_bounds = array<i64: 1, 128>}, {pipeline_mode = #tpu.pipeline_mode<synchronous>, transform_indices = @transform_4, window_bounds = array<i64: 1, 128>}, {pipeline_mode = #tpu.pipeline_mode<synchronous>, transform_indices = @transform_5, window_bounds = array<i64: 1, 128>}, {transform_indices = @transform_6, window_bounds = array<i64: 8, 128>}]} {
    %c0 = arith.constant 0 : index
    %c0_0 = arith.constant 0 : index
    %0 = vector.load %arg1[%c0, %c0_0] : memref<8x128xf32, #tpu.memory_space<vmem>>, vector<8x128xf32>
    %c0_1 = arith.constant 0 : index
    %c0_2 = arith.constant 0 : index
    %1 = vector.load %arg3[%c0_1, %c0_2] : memref<1x128xf32, #tpu.memory_space<vmem>>, vector<1x128xf32>
    %2 = vector.broadcast %1 : vector<1x128xf32> to vector<8x128xf32>
    %3 = arith.subf %0, %2 : vector<8x128xf32>
    %c0_3 = arith.constant 0 : index
    %c0_4 = arith.constant 0 : index
    %4 = vector.load %arg4[%c0_3, %c0_4] : memref<1x128xf32, #tpu.memory_space<vmem>>, vector<1x128xf32>
    %5 = vector.broadcast %4 : vector<1x128xf32> to vector<8x128xf32>
    %6 = arith.mulf %3, %5 : vector<8x128xf32>
    %c0_5 = arith.constant 0 : index
    %c0_6 = arith.constant 0 : index
    %7 = vector.load %arg5[%c0_5, %c0_6] : memref<1x128xf32, #tpu.memory_space<vmem>>, vector<1x128xf32>
    %8 = vector.broadcast %7 : vector<1x128xf32> to vector<8x128xf32>
    %9 = arith.mulf %6, %8 : vector<8x128xf32>
    %c0_7 = arith.constant 0 : index
    %c0_8 = arith.constant 0 : index
    %10 = vector.load %arg6[%c0_7, %c0_8] : memref<1x128xf32, #tpu.memory_space<vmem>>, vector<1x128xf32>
    %11 = vector.broadcast %10 : vector<1x128xf32> to vector<8x128xf32>
    %12 = arith.addf %9, %11 : vector<8x128xf32>
    %c0_9 = arith.constant 0 : index
    %c0_10 = arith.constant 0 : index
    %13 = vector.load %arg2[%c0_9, %c0_10] : memref<8x128xf32, #tpu.memory_space<vmem>>, vector<8x128xf32>
    %14 = arith.addf %12, %13 : vector<8x128xf32>
    %c0_11 = arith.constant 0 : index
    %c0_12 = arith.constant 0 : index
    %15 = vector.load %arg7[%c0_11, %c0_12] : memref<8x128xf32, #tpu.memory_space<vmem>>, vector<8x128xf32>
    tpu.vector_store %arg7[%c0_11, %c0_12], %14 {strides = array<i32>} : memref<8x128xf32, #tpu.memory_space<vmem>>, vector<8x128xf32>,
    return
  }
  func.func @transform_0(%arg0: i32) -> (i32, i32) {
    %c0_i32 = arith.constant 0 : i32
    %c0_i32_0 = arith.constant 0 : i32
    return %arg0, %c0_i32 : i32, i32
  }
  func.func @transform_1(%arg0: i32) -> (i32, i32) {
    %c0_i32 = arith.constant 0 : i32
    %c0_i32_0 = arith.constant 0 : i32
    return %arg0, %c0_i32 : i32, i32
  }
  func.func @transform_2(%arg0: i32) -> (i32, i32) {
    %c0_i32 = arith.constant 0 : i32
    %c0_i32_0 = arith.constant 0 : i32
    %c0_i32_1 = arith.constant 0 : i32
    return %c0_i32, %c0_i32_0 : i32, i32
  }
  func.func @transform_3(%arg0: i32) -> (i32, i32) {
    %c0_i32 = arith.constant 0 : i32
    %c0_i32_0 = arith.constant 0 : i32
    %c0_i32_1 = arith.constant 0 : i32
    return %c0_i32, %c0_i32_0 : i32, i32
  }
  func.func @transform_4(%arg0: i32) -> (i32, i32) {
    %c0_i32 = arith.constant 0 : i32
    %c0_i32_0 = arith.constant 0 : i32
    %c0_i32_1 = arith.constant 0 : i32
    return %c0_i32, %c0_i32_0 : i32, i32
  }
  func.func @transform_5(%arg0: i32) -> (i32, i32) {
    %c0_i32 = arith.constant 0 : i32
    %c0_i32_0 = arith.constant 0 : i32
    %c0_i32_1 = arith.constant 0 : i32
    return %c0_i32, %c0_i32_0 : i32, i32
  }
  func.func @transform_6(%arg0: i32) -> (i32, i32) {
    %c0_i32 = arith.constant 0 : i32
    %c0_i32_0 = arith.constant 0 : i32
    return %arg0, %c0_i32 : i32, i32
  }
}

module attributes {stable_mosaic.version = 11 : i64} {
  func.func @_proj_kernel(%arg0: i32, %arg1: memref<8x128xf32, #tpu.memory_space<vmem>>, %arg2: memref<8x128xf32, #tpu.memory_space<vmem>>, %arg3: memref<128x128xf32, #tpu.memory_space<vmem>>, %arg4: memref<1x128xf32, #tpu.memory_space<vmem>>, %arg5: memref<128x128xf32, #tpu.memory_space<vmem>>, %arg6: memref<1x128xf32, #tpu.memory_space<vmem>>, %arg7: memref<128x128xf32, #tpu.memory_space<vmem>>, %arg8: memref<1x128xf32, #tpu.memory_space<vmem>>, %arg9: memref<8x128xf32, #tpu.memory_space<vmem>>, %arg10: memref<8x128xf32, #tpu.memory_space<vmem>>, %arg11: memref<8x128xf32, #tpu.memory_space<vmem>>) attributes {dimension_semantics = [#tpu.dimension_semantics<parallel>], iteration_bounds = array<i64: 2>, scalar_prefetch = 0 : i64, scratch_operands = 0 : i64, tpu.core_type = #tpu.core_type<tc>, window_params = [{transform_indices = @transform_0, window_bounds = array<i64: 8, 128>}, {transform_indices = @transform_1, window_bounds = array<i64: 8, 128>}, {pipeline_mode = #tpu.pipeline_mode<synchronous>, transform_indices = @transform_2, window_bounds = array<i64: 128, 128>}, {pipeline_mode = #tpu.pipeline_mode<synchronous>, transform_indices = @transform_3, window_bounds = array<i64: 1, 128>}, {pipeline_mode = #tpu.pipeline_mode<synchronous>, transform_indices = @transform_4, window_bounds = array<i64: 128, 128>}, {pipeline_mode = #tpu.pipeline_mode<synchronous>, transform_indices = @transform_5, window_bounds = array<i64: 1, 128>}, {pipeline_mode = #tpu.pipeline_mode<synchronous>, transform_indices = @transform_6, window_bounds = array<i64: 128, 128>}, {pipeline_mode = #tpu.pipeline_mode<synchronous>, transform_indices = @transform_7, window_bounds = array<i64: 1, 128>}, {transform_indices = @transform_8, window_bounds = array<i64: 8, 128>}, {transform_indices = @transform_9, window_bounds = array<i64: 8, 128>}, {transform_indices = @transform_10, window_bounds = array<i64: 8, 128>}]} {
    %c0 = arith.constant 0 : index
    %c0_0 = arith.constant 0 : index
    %0 = vector.load %arg1[%c0, %c0_0] : memref<8x128xf32, #tpu.memory_space<vmem>>, vector<8x128xf32>
    %c0_1 = arith.constant 0 : index
    %c0_2 = arith.constant 0 : index
    %1 = vector.load %arg2[%c0_1, %c0_2] : memref<8x128xf32, #tpu.memory_space<vmem>>, vector<8x128xf32>
    %c0_3 = arith.constant 0 : index
    %c0_4 = arith.constant 0 : index
    %2 = vector.load %arg3[%c0_3, %c0_4] : memref<128x128xf32, #tpu.memory_space<vmem>>, vector<128x128xf32>
    %cst = arith.constant dense<0.000000e+00> : vector<8x128xf32>
    %3 = tpu.matmul %0, %2, %cst {dimension_numbers = #tpu.dot_dimension_numbers<[1], [0], [0], [1], [0, 0, 1, 1], [], []>} : vector<8x128xf32>, vector<128x128xf32>, vector<8x128xf32> -> vector<8x128xf32>
    %c0_5 = arith.constant 0 : index
    %c0_6 = arith.constant 0 : index
    %4 = vector.load %arg4[%c0_5, %c0_6] : memref<1x128xf32, #tpu.memory_space<vmem>>, vector<1x128xf32>
    %5 = vector.broadcast %4 : vector<1x128xf32> to vector<8x128xf32>
    %6 = arith.addf %3, %5 : vector<8x128xf32>
    %c0_7 = arith.constant 0 : index
    %c0_8 = arith.constant 0 : index
    %7 = vector.load %arg5[%c0_7, %c0_8] : memref<128x128xf32, #tpu.memory_space<vmem>>, vector<128x128xf32>
    %cst_9 = arith.constant dense<0.000000e+00> : vector<8x128xf32>
    %8 = tpu.matmul %1, %7, %cst_9 {dimension_numbers = #tpu.dot_dimension_numbers<[1], [0], [0], [1], [0, 0, 1, 1], [], []>} : vector<8x128xf32>, vector<128x128xf32>, vector<8x128xf32> -> vector<8x128xf32>
    %c0_10 = arith.constant 0 : index
    %c0_11 = arith.constant 0 : index
    %9 = vector.load %arg6[%c0_10, %c0_11] : memref<1x128xf32, #tpu.memory_space<vmem>>, vector<1x128xf32>
    %10 = vector.broadcast %9 : vector<1x128xf32> to vector<8x128xf32>
    %11 = arith.addf %8, %10 : vector<8x128xf32>
    %c0_12 = arith.constant 0 : index
    %c0_13 = arith.constant 0 : index
    %12 = vector.load %arg7[%c0_12, %c0_13] : memref<128x128xf32, #tpu.memory_space<vmem>>, vector<128x128xf32>
    %cst_14 = arith.constant dense<0.000000e+00> : vector<8x128xf32>
    %13 = tpu.matmul %1, %12, %cst_14 {dimension_numbers = #tpu.dot_dimension_numbers<[1], [0], [0], [1], [0, 0, 1, 1], [], []>} : vector<8x128xf32>, vector<128x128xf32>, vector<8x128xf32> -> vector<8x128xf32>
    %c0_15 = arith.constant 0 : index
    %c0_16 = arith.constant 0 : index
    %14 = vector.load %arg8[%c0_15, %c0_16] : memref<1x128xf32, #tpu.memory_space<vmem>>, vector<1x128xf32>
    %15 = vector.broadcast %14 : vector<1x128xf32> to vector<8x128xf32>
    %16 = arith.addf %13, %15 : vector<8x128xf32>
    %c0_17 = arith.constant 0 : index
    %c0_18 = arith.constant 0 : index
    %17 = vector.load %arg9[%c0_17, %c0_18] : memref<8x128xf32, #tpu.memory_space<vmem>>, vector<8x128xf32>
    tpu.vector_store %arg9[%c0_17, %c0_18], %6 {strides = array<i32>} : memref<8x128xf32, #tpu.memory_space<vmem>>, vector<8x128xf32>,
    %c0_19 = arith.constant 0 : index
    %c0_20 = arith.constant 0 : index
    %18 = vector.load %arg10[%c0_19, %c0_20] : memref<8x128xf32, #tpu.memory_space<vmem>>, vector<8x128xf32>
    tpu.vector_store %arg10[%c0_19, %c0_20], %11 {strides = array<i32>} : memref<8x128xf32, #tpu.memory_space<vmem>>, vector<8x128xf32>,
    %c0_21 = arith.constant 0 : index
    %c0_22 = arith.constant 0 : index
    %19 = vector.load %arg11[%c0_21, %c0_22] : memref<8x128xf32, #tpu.memory_space<vmem>>, vector<8x128xf32>
    tpu.vector_store %arg11[%c0_21, %c0_22], %16 {strides = array<i32>} : memref<8x128xf32, #tpu.memory_space<vmem>>, vector<8x128xf32>,
    return
  }
  func.func @transform_0(%arg0: i32) -> (i32, i32) {
    %c0_i32 = arith.constant 0 : i32
    %c0_i32_0 = arith.constant 0 : i32
    return %arg0, %c0_i32 : i32, i32
  }
  func.func @transform_1(%arg0: i32) -> (i32, i32) {
    %c0_i32 = arith.constant 0 : i32
    %c0_i32_0 = arith.constant 0 : i32
    return %arg0, %c0_i32 : i32, i32
  }
  func.func @transform_2(%arg0: i32) -> (i32, i32) {
    %c0_i32 = arith.constant 0 : i32
    %c0_i32_0 = arith.constant 0 : i32
    %c0_i32_1 = arith.constant 0 : i32
    return %c0_i32, %c0_i32_0 : i32, i32
  }
  func.func @transform_3(%arg0: i32) -> (i32, i32) {
    %c0_i32 = arith.constant 0 : i32
    %c0_i32_0 = arith.constant 0 : i32
    %c0_i32_1 = arith.constant 0 : i32
    return %c0_i32, %c0_i32_0 : i32, i32
  }
  func.func @transform_4(%arg0: i32) -> (i32, i32) {
    %c0_i32 = arith.constant 0 : i32
    %c0_i32_0 = arith.constant 0 : i32
    %c0_i32_1 = arith.constant 0 : i32
    return %c0_i32, %c0_i32_0 : i32, i32
  }
  func.func @transform_5(%arg0: i32) -> (i32, i32) {
    %c0_i32 = arith.constant 0 : i32
    %c0_i32_0 = arith.constant 0 : i32
    %c0_i32_1 = arith.constant 0 : i32
    return %c0_i32, %c0_i32_0 : i32, i32
  }
  func.func @transform_6(%arg0: i32) -> (i32, i32) {
    %c0_i32 = arith.constant 0 : i32
    %c0_i32_0 = arith.constant 0 : i32
    %c0_i32_1 = arith.constant 0 : i32
    return %c0_i32, %c0_i32_0 : i32, i32
  }
  func.func @transform_7(%arg0: i32) -> (i32, i32) {
    %c0_i32 = arith.constant 0 : i32
    %c0_i32_0 = arith.constant 0 : i32
    %c0_i32_1 = arith.constant 0 : i32
    return %c0_i32, %c0_i32_0 : i32, i32
  }
  func.func @transform_8(%arg0: i32) -> (i32, i32) {
    %c0_i32 = arith.constant 0 : i32
    %c0_i32_0 = arith.constant 0 : i32
    return %arg0, %c0_i32 : i32, i32
  }
  func.func @transform_9(%arg0: i32) -> (i32, i32) {
    %c0_i32 = arith.constant 0 : i32
    %c0_i32_0 = arith.constant 0 : i32
    return %arg0, %c0_i32 : i32, i32
  }
  func.func @transform_10(%arg0: i32) -> (i32, i32) {
    %c0_i32 = arith.constant 0 : i32
    %c0_i32_0 = arith.constant 0 : i32
    return %arg0, %c0_i32 : i32, i32
  }
}

</mosaic_0001>

<bundles_post_ra>
// kernel: mfa_block_forward.6
= control target key start
LH: loop header
LB: loop body
LE: loop exit
PB: predicated region body
PF: predicated region fallthrough
CT: control target
= control target key end

     0   :  { %s533_s18 = smov 0   ;;  %s643_s0 = inlined_call_operand.vmem [shape: f32[16,128], index: 0, kind: input, shape index: {}]   ;;  %s644_s1 = inlined_call_operand.vmem [shape: f32[128,128], index: 1, kind: input, shape index: {}]   ;;  %s645_s2 = inlined_call_operand.vmem [shape: f32[1,128], index: 2, kind: input, shape index: {}]   ;;  %s646_s3 = inlined_call_operand.vmem [shape: f32[16,128], index: 3, kind: output, shape index: {0}]   ;;  %s647_s4 = inlined_call_operand.vmem [shape: f32[1,128], index: 4, kind: output, shape index: {1}]   ;;  %s648_s5 = inlined_call_operand.vmem [shape: f32[1,128], index: 5, kind: output, shape index: {2}]  }
   0x1 LB: > { %s539_s19 = sadd.s32 4294967295, %s498_s18   ;;  %p419_p0 = scmp.ge.s32.totalorder %s498_s18, 1  ;;  %s498_s18 = sphi %s533_s18, %s16_s18  }
   0x2   : > { %p181_p1 = scmp.lt.s32.totalorder %s498_s18, 3 }
   0x4   : > { %p182_p2 = pnand %p419_p0, %p181_p1 }
   0x5   : > { %p207_p3 = scmp.lt.s32.totalorder (!%p182_p2), %s539_s19, 1  ;;  %p422_p4 = scmp.ne.s32.totalorder (!%p182_p2), %s539_s19, 0 }
   0x6   : > { %185 = sbr.rel (%p182_p2) target bundleno = 294 (0x126), region = 32 }
   0xb   : > { %s208_s20 = scalar_select %p207_p3, %s539_s19, 1 }
   0xc   : > { %218 = sbr.rel (%p422_p4) target bundleno = 19 (0x13), region = 36 }
   0xd   : > { %s420_s21 = sshll.u32 %s208_s20, 3 }
   0xe   : > { %s548_s24 = scalar_lea.vmem %s643_s0, %s420_s21  ;;  %s553_s27 = scalar_lea.vmem %s646_s3, %s420_s21 }
  0x11   : > { %v500_v0 = vmov 0.0  }
  0x12   : > { %219 = vst [vmem:[%s647_s4] sm:$0x1] %v500_v0  ;;  %220 = vst [vmem:[%s648_s5] sm:$0x1] %v500_v0 }
  0x13 PF: > { %v237_v1 = vld [vmem:[%s644_s1 + $0x78] sm:$0xff]  ;;  %v501_v2 = vmov 0.0   ;;  %v236_v3 = vld [vmem:[%s644_s1 + $0x70] sm:$0xff]  ;;  %vm502_vm0 = vmmov 0   ;;  %v235_v4 = vld [vmem:[%s644_s1 + $0x68] sm:$0xff]  ;;  %p424_p5 = scmp.ne.s32.totalorder %s539_s19, 1 }
  0x14   : > { %444 = vmatprep.subr.mxu0 %v501_v2  ;;  %476 = vmatprep.mubr.msk.f32.mxu0 %vm502_vm0, %v501_v2  ;;  %v234_v5 = vld [vmem:[%s644_s1 + $0x60] sm:$0xff]  ;;  %v233_v6 = vld [vmem:[%s644_s1 + $0x58] sm:$0xff]  ;;  %v232_v7 = vld [vmem:[%s644_s1 + $0x50] sm:$0xff] }
  0x15   : > { %445 = vmatpush3.msra.mxu0 %v237_v1  ;;  %v231_v8 = vld [vmem:[%s644_s1 + $0x48] sm:$0xff]  ;;  %v230_v9 = vld [vmem:[%s644_s1 + $0x40] sm:$0xff]  ;;  %v229_v10 = vld [vmem:[%s644_s1 + $0x38] sm:$0xff] }
  0x16   : > { %446 = vmatprep.subr.mxu0 %v501_v2  ;;  %v228_v11 = vld [vmem:[%s644_s1 + $0x30] sm:$0xff]  ;;  %v227_v12 = vld [vmem:[%s644_s1 + $0x28] sm:$0xff]  ;;  %v226_v13 = vld [vmem:[%s644_s1 + $0x20] sm:$0xff] }
  0x17   : > { %447 = vmatpush3.msra.mxu0 %v236_v3  ;;  %v225_v14 = vld [vmem:[%s644_s1 + $0x18] sm:$0xff]  ;;  %v224_v15 = vld [vmem:[%s644_s1 + $0x10] sm:$0xff]  ;;  %v223_v16 = vld [vmem:[%s644_s1 + $0x8] sm:$0xff] }
  0x18   : > { %448 = vmatprep.subr.mxu0 %v501_v2  ;;  %v222_v17 = vld [vmem:[%s644_s1] sm:$0xff] }
  0x19   : > { %449 = vmatpush3.msra.mxu0 %v235_v4  ;;  %v221_v18 = vld [vmem:[%s548_s24] sm:$0xff] }
  0x1a   : > { %450 = vmatprep.subr.mxu0 %v501_v2  ;;  %v423_v19 = vld [vmem:[%s645_s2] ss:$0 sm:$0xff] }
  0x1b   : > { %451 = vmatpush3.msra.mxu0 %v234_v5  ;;  %v316_v33 = vld [vmem:[%s647_s4] sm:$0x1] }
  0x1c   : > { %452 = vmatprep.subr.mxu0 %v501_v2  ;;  %v325_v36 = vld [vmem:[%s648_s5] sm:$0x1] }
  0x1d   : > { %453 = vmatpush3.msra.mxu0 %v233_v6 }
  0x1e   : > { %454 = vmatprep.subr.mxu0 %v501_v2 }
  0x1f   : > { %455 = vmatpush3.msra.mxu0 %v232_v7 }
  0x20   : > { %456 = vmatprep.subr.mxu0 %v501_v2 }
  0x21   : > { %457 = vmatpush3.msra.mxu0 %v231_v8 }
  0x22   : > { %458 = vmatprep.subr.mxu0 %v501_v2 }
  0x23   : > { %459 = vmatpush3.msra.mxu0 %v230_v9 }
  0x24   : > { %460 = vmatprep.subr.mxu0 %v501_v2 }
  0x25   : > { %461 = vmatpush3.msra.mxu0 %v229_v10 }
  0x26   : > { %462 = vmatprep.subr.mxu0 %v501_v2 }
  0x27   : > { %463 = vmatpush3.msra.mxu0 %v228_v11 }
  0x28   : > { %464 = vmatprep.subr.mxu0 %v501_v2 }
  0x29   : > { %465 = vmatpush3.msra.mxu0 %v227_v12 }
  0x2a   : > { %466 = vmatprep.subr.mxu0 %v501_v2 }
  0x2b   : > { %467 = vmatpush3.msra.mxu0 %v226_v13 }
  0x2c   : > { %468 = vmatprep.subr.mxu0 %v501_v2 }
  0x2d   : > { %469 = vmatpush3.msra.mxu0 %v225_v14 }
  0x2e   : > { %470 = vmatprep.subr.mxu0 %v501_v2 }
  0x2f   : > { %471 = vmatpush3.msra.mxu0 %v224_v15 }
  0x30   : > { %472 = vmatprep.subr.mxu0 %v501_v2 }
  0x31   : > { %473 = vmatpush3.msra.mxu0 %v223_v16 }
  0x32   : > { %474 = vmatprep.subr.mxu0 %v501_v2 }
  0x33   : > { %475 = vmatpush3.msra.mxu0 %v222_v17 }
  0x34   : > { %477 = vmatmul.mubr.f32.vlgmr.msra.gmra.mxu0 %v221_v18 }
  0xf4   : > { %v311_v20 = vpop.f32.mrf.mxu0 }
  0xf5   : > { %v312_v21 = vadd.f32 %v423_v19, %v311_v20 }
  0xf6   : > { %v478_v22 = vpop.f32.mrf.mxu0 }
  0xf7   : > { %315 = vst [vmem:[%s553_s27] sm:$0xff] %v312_v21  ;;  %v317_v23 = vrot.slane %v312_v21, 4  ;;  %v326_v24 = vmul.f32 %v312_v21, %v312_v21 }
  0xf9   : > { %v318_v25 = vadd.f32 %v317_v23, %v312_v21  ;;  %v327_v26 = vrot.slane %v326_v24, 4 }
  0xfb   : > { %v319_v27 = vrot.slane %v318_v25, 2  ;;  %v328_v28 = vadd.f32 %v327_v26, %v326_v24 }
  0xfd   : > { %v320_v29 = vadd.f32 %v319_v27, %v318_v25  ;;  %v329_v30 = vrot.slane %v328_v28, 2 }
  0xff   : > { %v321_v31 = vrot.slane %v320_v29, 1  ;;  %v330_v32 = vadd.f32 %v329_v30, %v328_v28 }
 0x101   : > { %v322_v34 = vadd.f32 %v321_v31, %v320_v29  ;;  %v331_v35 = vrot.slane %v330_v32, 1 }
 0x103   : > { %v323_v37 = vadd.f32 %v322_v34, %v316_v33  ;;  %v332_v38 = vadd.f32 %v331_v35, %v330_v32  ;;  %338 = sbr.rel (%p424_p5) target bundleno = 294 (0x126), region = 40 }
 0x105   : > { %324 = vst [vmem:[%s647_s4] sm:$0x1] %v323_v37  ;;  %v333_v39 = vadd.f32 %v332_v38, %v325_v36 }
 0x107   : > { %334 = vst [vmem:[%s648_s5] sm:$0x1] %v333_v39 }
 0x10c   : > { %v339_v40 = vld [vmem:[%s647_s4] sm:$0x1] }
 0x10d   : > { %v340_v42 = vmul.f32 0.0625, %v339_v40 }
 0x10e   : > { %v341_v41 = vld [vmem:[%s648_s5] sm:$0x1] }
 0x10f   : > { %v342_v43 = vmul.f32 0.0625, %v341_v41  ;;  %v343_v44 = vmul.f32 %v340_v42, %v340_v42  ;;  %346 = vst [vmem:[%s647_s4] sm:$0x1] %v340_v42 }
 0x111   : > { %v344_v45 = vsub.f32 %v342_v43, %v343_v44 }
 0x113   : > { %v345_v46 = vmax.f32 %v344_v45, 0.0 }
 0x115   : > { %v347_v47 = vadd.f32 1e-05, %v345_v46 }
 0x117   : > { %490 = vrsqrt.f32 %v347_v47 }
 0x124   : > { %v491_v48 = vpop.eup %490 }
 0x125   : > { %349 = vst [vmem:[%s648_s5] sm:$0x1] %v491_v48 }
 0x126 PF: > { %s16_s18 = sadd.s32 1, %s498_s18  }
 0x127   : > { %p13_p6 = scmp.ge.s32.totalorder %s16_s18, 4  }
 0x129   :  { %15 = sbr.rel (!%p13_p6) target bundleno = 1 (0x1), region = 86 }

// kernel: mfa_block_forward.7
= control target key start
LH: loop header
LB: loop body
LE: loop exit
PB: predicated region body
PF: predicated region fallthrough
CT: control target
= control target key end

     0   :  { %s430_s21 = smov 0   ;;  %s456_s0 = inlined_call_operand.vmem [shape: f32[16,128], index: 0, kind: input, shape index: {}]   ;;  %s457_s1 = inlined_call_operand.vmem [shape: f32[16,128], index: 1, kind: input, shape index: {}]   ;;  %s458_s2 = inlined_call_operand.vmem [shape: f32[1,128], index: 2, kind: input, shape index: {}]   ;;  %s459_s3 = inlined_call_operand.vmem [shape: f32[1,128], index: 3, kind: input, shape index: {}]   ;;  %s460_s4 = inlined_call_operand.vmem [shape: f32[1,128], index: 4, kind: input, shape index: {}]   ;;  %s461_s5 = inlined_call_operand.vmem [shape: f32[1,128], index: 5, kind: input, shape index: {}]   ;;  %s462_s6 = inlined_call_operand.vmem [shape: f32[16,128], index: 6, kind: output, shape index: {}]  }
   0x1 LB: > { %s365_s22 = sadd.s32 4294967295, %s393_s21   ;;  %p369_p0 = scmp.ge.s32.totalorder %s393_s21, 1  ;;  %s393_s21 = sphi %s430_s21, %s16_s21  }
   0x2   : > { %p220_p1 = scmp.lt.s32.totalorder %s393_s21, 3 }
   0x4   : > { %p221_p2 = pnand %p369_p0, %p220_p1 }
   0x5   : > { %p252_p3 = scmp.lt.s32.totalorder (!%p221_p2), %s365_s22, 1 }
   0x6   : > { %224 = sbr.rel (%p221_p2) target bundleno = 26 (0x1a), region = 44 }
   0xb   : > { %s464_s22 = smov (!%p252_p3, %s365_s22), 1  ;;  %v373_v0 = vld [vmem:[%s458_s2] ss:$0 sm:$0xff] }
   0xc   : > { %s370_s23 = sshll.u32 %s464_s22, 3  ;;  %v374_v2 = vld [vmem:[%s459_s3] ss:$0 sm:$0xff] }
   0xd   : > { %s255_s28 = scalar_lea.vmem %s456_s0, %s370_s23  ;;  %v375_v4 = vld [vmem:[%s460_s4] ss:$0 sm:$0xff]  ;;  %s259_s11 = scalar_lea.vmem %s457_s1, %s370_s23 }
   0xe   : > { %v264_v1 = vld [vmem:[%s255_s28] sm:$0xff]  ;;  %s263_s16 = scalar_lea.vmem %s462_s6, %s370_s23 }
   0xf   : > { %v272_v3 = vsub.f32 %v264_v1, %v373_v0  ;;  %v376_v6 = vld [vmem:[%s461_s5] ss:$0 sm:$0xff] }
  0x10   : > { %v297_v8 = vld [vmem:[%s259_s11] sm:$0xff] }
  0x11   : > { %v280_v5 = vmul.f32 %v374_v2, %v272_v3 }
  0x13   : > { %v288_v7 = vmul.f32 %v375_v4, %v280_v5 }
  0x15   : > { %v296_v9 = vadd.f32 %v376_v6, %v288_v7 }
  0x17   : > { %v298_v10 = vadd.f32 %v297_v8, %v296_v9 }
  0x19   : > { %299 = vst [vmem:[%s263_s16] sm:$0xff] %v298_v10 }
  0x1a PF: > { %s16_s21 = sadd.s32 1, %s393_s21  }
  0x1b   : > { %p13_p4 = scmp.ge.s32.totalorder %s16_s21, 4  }
  0x1d   :  { %15 = sbr.rel (!%p13_p4) target bundleno = 1 (0x1), region = 77 }

// kernel: mfa_block_forward.5
= control target key start
LH: loop header
LB: loop body
LE: loop exit
PB: predicated region body
PF: predicated region fallthrough
CT: control target
= control target key end

     0   :  { %s596_s12 = smov 0   ;;  %s598_s13 = smov 0   ;;  %s662_s0 = inlined_call_operand.vmem [shape: f32[16,128], index: 0, kind: input, shape index: {}]   ;;  %s663_s1 = inlined_call_operand.vmem [shape: f32[16,128], index: 1, kind: input, shape index: {}]   ;;  %s664_s2 = inlined_call_operand.vmem [shape: f32[16,128], index: 2, kind: input, shape index: {}]   ;;  %s665_s3 = inlined_call_operand.vmem [shape: f32[16,128], index: 3, kind: output, shape index: {}]  }
   0x1   :  { %s600_s14 = smov 0   ;;  %s602_s15 = smov 0  }
   0x2   :  { %s604_s16 = smov 0  }
   0x3 LB: > { %s22_s17 = sadd.s32 1, %s563_s14  ;;  %s25_s18 = sadd.s32 1, %s567_s15  ;;  %s571_s16 = sphi %s604_s16, %s13_s16   ;;  %s567_s15 = sphi %s602_s15, %s669_s15   ;;  %s563_s14 = sphi %s600_s14, %s668_s14   ;;  %s559_s13 = sphi %s598_s13, %s667_s13   ;;  %s555_s12 = sphi %s596_s12, %s666_s12  }
   0x4   : > { %p23_p0 = scmp.ge.s32.totalorder %s22_s17, 2  ;;  %p466_p1 = scmp.ge.s32.totalorder %s571_s16, 1 }
   0x5   : > { %p166_p2 = scmp.lt.s32.totalorder %s571_s16, 5 }
   0x6   : > { %s671_s17 = smov (%p23_p0, %s22_s17), 0  ;;  %s673_s18 = smov (!%p23_p0, %s25_s18), %s567_s15 }
   0x7   : > { %p167_p3 = pnand %p466_p1, %p166_p2  ;;  %p27_p4 = scmp.ge.s32.totalorder %s673_s18, 2 }
   0x8   : > { %p196_p5 = scmp.lt.s32.totalorder (!%p167_p3), %s559_s13, 1  ;;  %p200_p6 = scmp.lt.s32.totalorder (!%p167_p3), %s555_s12, 1 }
   0x9   : > { %s675_s18 = smov (%p27_p4, %s673_s18), 0  ;;  %170 = sbr.rel (%p167_p3) target bundleno = 427 (0x1ab), region = 32 }
   0xa   : > { %p471_p7 = scmp.ne.s32.totalorder (!%p167_p3), %s555_s12, 0 }
   0xe   : > { %s677_s13 = smov (!%p196_p5, %s559_s13), 1 }
   0xf   : > { %s201_s19 = scalar_select %p200_p6, %s555_s12, 1 }
  0x10   : > { %s467_s20 = sshll.u32 %s677_s13, 3  ;;  %215 = sbr.rel (%p471_p7) target bundleno = 23 (0x17), region = 36 }
  0x11   : > { %s199_s23 = scalar_lea.vmem %s662_s0, %s467_s20  ;;  %s468_s24 = sshll.u32 %s201_s19, 3 }
  0x12   : > { %s203_s27 = scalar_lea.vmem %s663_s1, %s468_s24  ;;  %s207_s30 = scalar_lea.vmem %s664_s2, %s468_s24 }
  0x13   : > { %s642_s6 = scalar_lea.vmem %s665_s3, %s467_s20 }
  0x15   : > { %v573_v0 = vmov 0.0  }
  0x16   : > { %216 = vst [vmem:[#allocation2] sm:$0xff] %v573_v0 }
  0x17 PF: > { %v218_v1 = vld [vmem:[%s203_s27] sm:$0xff]  ;;  %v574_v2 = vmov 0.0   ;;  %vm575_vm0 = vmmov 0   ;;  %vm291_vm1 = vcmask 64512   ;;  %p473_p8 = scmp.ne.s32.totalorder %s555_s12, 1 }
  0x18   : > { %480 = vmatprep.subr.mxu0 %v574_v2  ;;  %482 = vmatprep.mubr.msk.f32.mxu0 %vm575_vm0, %v574_v2  ;;  %v217_v3 = vld [vmem:[%s199_s23] sm:$0xff] }
  0x19   : > { %481 = vmatpush3.xpose.msra.mxu0 %v218_v1  ;;  %485 = vmatprep.subr.mxu1 %v574_v2  ;;  %v290_v4 = vld [vmem:[%s207_s30] sm:$0xff] }
  0x1a   : > { %487 = vmatprep.mubr.msk.f32.mxu1 %vm575_vm0, %v574_v2  ;;  %486 = vmatpush3.msra.mxu1 %v290_v4 }
  0x1c   : > { %483 = vmatmul.mubr.f32.vlgmr.msra.gmra.mxu0 %v217_v3 }
  0x1d   : > { %v289_v7 = vld [vmem:[#allocation2] sm:$0xff] }
  0xdc   : > { %v285_v5 = vpop.f32.mrf.mxu0 }
  0xdd   : > { %488 = vmatmul.mubr.msk.f32.vlgmr.msra.gmra.mxu1 %vm291_vm1, %v285_v5 }
  0xde   : > { %v484_v6 = vpop.f32.mrf.mxu0 }
 0x19c   : > { %370 = sbr.rel (%p473_p8) target bundleno = 427 (0x1ab), region = 40 }
 0x19d   : > { %v361_v8 = vpop.f32.mrf.mxu1 }
 0x19e   : > { %v365_v9 = vadd.f32 %v361_v8, %v289_v7 }
 0x19f   : > { %v489_v10 = vpop.f32.mrf.mxu1 }
 0x1a0   : > { %366 = vst [vmem:[#allocation2] sm:$0xff] %v365_v9 }
 0x1a7   : > { %v371_v11 = vld [vmem:[#allocation2] sm:$0xff] }
 0x1a8   : > { %v372_v12 = vmul.f32 0.0625, %v371_v11 }
 0x1aa   : > { %373 = vst [vmem:[%s642_s6] sm:$0xff] %v372_v12 }
 0x1ab PF: > { %s13_s16 = sadd.s32 1, %s571_s16   ;;  %s666_s12 = smov %s563_s14 }
 0x1ac   : > { %p10_p9 = scmp.ge.s32.totalorder %s13_s16, 6   ;;  %s667_s13 = smov %s567_s15 }
 0x1ad   : > { %s668_s14 = smov %s671_s17  ;;  %s669_s15 = smov %s675_s18 }
 0x1ae   :  { %12 = sbr.rel (!%p10_p9) target bundleno = 3 (0x3), region = 76 }

// kernel: mfa_block_forward.4
= control target key start
LH: loop header
LB: loop body
LE: loop exit
PB: predicated region body
PF: predicated region fallthrough
CT: control target
= control target key end

     0   :  { %s1050_s13 = smov 0   ;;  %s1294_s0 = inlined_call_operand.vmem [shape: f32[16,128], index: 0, kind: input, shape index: {}]   ;;  %s1295_s1 = inlined_call_operand.vmem [shape: f32[16,128], index: 1, kind: input, shape index: {}]   ;;  %s1296_s2 = inlined_call_operand.vmem [shape: f32[128,128], index: 2, kind: input, shape index: {}]   ;;  %s1297_s3 = inlined_call_operand.vmem [shape: f32[1,128], index: 3, kind: input, shape index: {}]   ;;  %s1298_s4 = inlined_call_operand.vmem [shape: f32[128,128], index: 4, kind: input, shape index: {}]   ;;  %s1299_s5 = inlined_call_operand.vmem [shape: f32[1,128], index: 5, kind: input, shape index: {}]   ;;  %s1300_s6 = inlined_call_operand.vmem [shape: f32[128,128], index: 6, kind: input, shape index: {}]   ;;  %s1301_s7 = inlined_call_operand.vmem [shape: f32[1,128], index: 7, kind: input, shape index: {}]   ;;  %s1302_s8 = inlined_call_operand.vmem [shape: f32[16,128], index: 8, kind: output, shape index: {0}]   ;;  %s1303_s9 = inlined_call_operand.vmem [shape: f32[16,128], index: 9, kind: output, shape index: {1}]   ;;  %s1304_s10 = inlined_call_operand.vmem [shape: f32[16,128], index: 10, kind: output, shape index: {2}]  }
   0x1 LB: > { %s804_s14 = sadd.s32 4294967295, %s991_s13   ;;  %p808_p0 = scmp.ge.s32.totalorder %s991_s13, 1  ;;  %s991_s13 = sphi %s1050_s13, %s21_s13  }
   0x2   : > { %p325_p1 = scmp.lt.s32.totalorder %s991_s13, 3 }
   0x4   : > { %p326_p2 = pnand %p808_p0, %p325_p1 }
   0x5   : > { %p373_p3 = scmp.lt.s32.totalorder (!%p326_p2), %s804_s14, 1 }
   0x6   : > { %329 = sbr.rel (%p326_p2) target bundleno = 272 (0x110), region = 52 }
   0xb   : > { %v410_v0 = vld [vmem:[%s1296_s2 + $0x78] sm:$0xff]  ;;  %v993_v1 = vmov 0.0   ;;  %v409_v2 = vld [vmem:[%s1296_s2 + $0x70] sm:$0xff]  ;;  %vm994_vm0 = vmmov 0   ;;  %v408_v3 = vld [vmem:[%s1296_s2 + $0x68] sm:$0xff]  ;;  %s1306_s14 = smov (!%p373_p3, %s804_s14), 1 }
   0xc   : > { %870 = vmatprep.subr.mxu0 %v993_v1  ;;  %905 = vmatprep.subr.mxu1 %v993_v1  ;;  %v407_v4 = vld [vmem:[%s1296_s2 + $0x60] sm:$0xff]  ;;  %v503_v5 = vld [vmem:[%s1298_s4 + $0x78] sm:$0xff]  ;;  %v502_v6 = vld [vmem:[%s1298_s4 + $0x70] sm:$0xff]  ;;  %s1160_s27 = sshll.u32 %s1306_s14, 3 }
   0xd   : > { %871 = vmatpush3.msra.mxu0 %v410_v0  ;;  %902 = vmatprep.mubr.msk.f32.mxu0 %vm994_vm0, %v993_v1  ;;  %v406_v7 = vld [vmem:[%s1296_s2 + $0x58] sm:$0xff]  ;;  %v501_v8 = vld [vmem:[%s1298_s4 + $0x68] sm:$0xff]  ;;  %v405_v9 = vld [vmem:[%s1296_s2 + $0x50] sm:$0xff]  ;;  %s376_s17 = scalar_lea.vmem %s1294_s0, %s1160_s27  ;;  %s380_s11 = scalar_lea.vmem %s1295_s1, %s1160_s27 }
   0xe   : > { %872 = vmatprep.subr.mxu0 %v993_v1  ;;  %937 = vmatprep.mubr.msk.f32.mxu1 %vm994_vm0, %v993_v1  ;;  %v500_v10 = vld [vmem:[%s1298_s4 + $0x60] sm:$0xff]  ;;  %v404_v11 = vld [vmem:[%s1296_s2 + $0x48] sm:$0xff]  ;;  %v499_v12 = vld [vmem:[%s1298_s4 + $0x58] sm:$0xff]  ;;  %s384_s14 = scalar_lea.vmem %s1302_s8, %s1160_s27  ;;  %s388_s18 = scalar_lea.vmem %s1303_s9, %s1160_s27 }
   0xf   : > { %873 = vmatpush3.msra.mxu0 %v409_v2  ;;  %906 = vmatpush3.msra.mxu1 %v503_v5  ;;  %v403_v13 = vld [vmem:[%s1296_s2 + $0x40] sm:$0xff]  ;;  %v498_v14 = vld [vmem:[%s1298_s4 + $0x50] sm:$0xff]  ;;  %v402_v15 = vld [vmem:[%s1296_s2 + $0x38] sm:$0xff]  ;;  %s392_s23 = scalar_lea.vmem %s1304_s10, %s1160_s27 }
  0x10   : > { %874 = vmatprep.subr.mxu0 %v993_v1  ;;  %907 = vmatprep.subr.mxu1 %v993_v1  ;;  %v497_v16 = vld [vmem:[%s1298_s4 + $0x48] sm:$0xff]  ;;  %v401_v17 = vld [vmem:[%s1296_s2 + $0x30] sm:$0xff]  ;;  %v496_v18 = vld [vmem:[%s1298_s4 + $0x40] sm:$0xff] }
  0x11   : > { %875 = vmatpush3.msra.mxu0 %v408_v3  ;;  %908 = vmatpush3.msra.mxu1 %v502_v6  ;;  %v400_v19 = vld [vmem:[%s1296_s2 + $0x28] sm:$0xff]  ;;  %v495_v20 = vld [vmem:[%s1298_s4 + $0x38] sm:$0xff]  ;;  %v399_v21 = vld [vmem:[%s1296_s2 + $0x20] sm:$0xff] }
  0x12   : > { %876 = vmatprep.subr.mxu0 %v993_v1  ;;  %909 = vmatprep.subr.mxu1 %v993_v1  ;;  %v494_v22 = vld [vmem:[%s1298_s4 + $0x30] sm:$0xff]  ;;  %v398_v23 = vld [vmem:[%s1296_s2 + $0x18] sm:$0xff]  ;;  %v493_v24 = vld [vmem:[%s1298_s4 + $0x28] sm:$0xff] }
  0x13   : > { %877 = vmatpush3.msra.mxu0 %v407_v4  ;;  %910 = vmatpush3.msra.mxu1 %v501_v8  ;;  %v397_v25 = vld [vmem:[%s1296_s2 + $0x10] sm:$0xff]  ;;  %v492_v26 = vld [vmem:[%s1298_s4 + $0x20] sm:$0xff]  ;;  %v396_v27 = vld [vmem:[%s1296_s2 + $0x8] sm:$0xff] }
  0x14   : > { %878 = vmatprep.subr.mxu0 %v993_v1  ;;  %911 = vmatprep.subr.mxu1 %v993_v1  ;;  %v491_v28 = vld [vmem:[%s1298_s4 + $0x18] sm:$0xff]  ;;  %v395_v29 = vld [vmem:[%s1296_s2] sm:$0xff]  ;;  %v490_v30 = vld [vmem:[%s1298_s4 + $0x10] sm:$0xff] }
  0x15   : > { %879 = vmatpush3.msra.mxu0 %v406_v7  ;;  %912 = vmatpush3.msra.mxu1 %v500_v10  ;;  %v393_v31 = vld [vmem:[%s376_s17] sm:$0xff]  ;;  %v596_v32 = vld [vmem:[%s1300_s6 + $0x78] sm:$0xff]  ;;  %v489_v33 = vld [vmem:[%s1298_s4 + $0x8] sm:$0xff] }
  0x16   : > { %880 = vmatprep.subr.mxu0 %v993_v1  ;;  %913 = vmatprep.subr.mxu1 %v993_v1  ;;  %v595_v34 = vld [vmem:[%s1300_s6 + $0x70] sm:$0xff]  ;;  %v488_v35 = vld [vmem:[%s1298_s4] sm:$0xff]  ;;  %v594_v36 = vld [vmem:[%s1300_s6 + $0x68] sm:$0xff] }
  0x17   : > { %881 = vmatpush3.msra.mxu0 %v405_v9  ;;  %914 = vmatpush3.msra.mxu1 %v499_v12  ;;  %v394_v37 = vld [vmem:[%s380_s11] sm:$0xff]  ;;  %v592_v39 = vld [vmem:[%s1300_s6 + $0x58] sm:$0xff]  ;;  %v591_v40 = vld [vmem:[%s1300_s6 + $0x50] sm:$0xff] }
  0x18   : > { %882 = vmatprep.subr.mxu0 %v993_v1  ;;  %915 = vmatprep.subr.mxu1 %v993_v1  ;;  %v593_v38 = vld [vmem:[%s1300_s6 + $0x60] sm:$0xff]  ;;  %v590_v41 = vld [vmem:[%s1300_s6 + $0x48] sm:$0xff]  ;;  %v588_v43 = vld [vmem:[%s1300_s6 + $0x38] sm:$0xff] }
  0x19   : > { %883 = vmatpush3.msra.mxu0 %v404_v11  ;;  %916 = vmatpush3.msra.mxu1 %v498_v14  ;;  %v589_v42 = vld [vmem:[%s1300_s6 + $0x40] sm:$0xff]  ;;  %v587_v44 = vld [vmem:[%s1300_s6 + $0x30] sm:$0xff]  ;;  %v586_v45 = vld [vmem:[%s1300_s6 + $0x28] sm:$0xff] }
  0x1a   : > { %884 = vmatprep.subr.mxu0 %v993_v1  ;;  %917 = vmatprep.subr.mxu1 %v993_v1  ;;  %v585_v46 = vld [vmem:[%s1300_s6 + $0x20] sm:$0xff]  ;;  %v584_v47 = vld [vmem:[%s1300_s6 + $0x18] sm:$0xff]  ;;  %v583_v48 = vld [vmem:[%s1300_s6 + $0x10] sm:$0xff] }
  0x1b   : > { %885 = vmatpush3.msra.mxu0 %v403_v13  ;;  %918 = vmatpush3.msra.mxu1 %v497_v16  ;;  %v582_v49 = vld [vmem:[%s1300_s6 + $0x8] sm:$0xff]  ;;  %v581_v50 = vld [vmem:[%s1300_s6] sm:$0xff] }
  0x1c   : > { %886 = vmatprep.subr.mxu0 %v993_v1  ;;  %919 = vmatprep.subr.mxu1 %v993_v1  ;;  %v814_v51 = vld [vmem:[%s1297_s3] ss:$0 sm:$0xff] }
  0x1d   : > { %887 = vmatpush3.msra.mxu0 %v402_v15  ;;  %920 = vmatpush3.msra.mxu1 %v496_v18  ;;  %v815_v55 = vld [vmem:[%s1299_s5] ss:$0 sm:$0xff] }
  0x1e   : > { %888 = vmatprep.subr.mxu0 %v993_v1  ;;  %921 = vmatprep.subr.mxu1 %v993_v1  ;;  %v816_v59 = vld [vmem:[%s1301_s7] ss:$0 sm:$0xff] }
  0x1f   : > { %889 = vmatpush3.msra.mxu0 %v401_v17  ;;  %922 = vmatpush3.msra.mxu1 %v495_v20 }
  0x20   : > { %890 = vmatprep.subr.mxu0 %v993_v1  ;;  %923 = vmatprep.subr.mxu1 %v993_v1 }
  0x21   : > { %891 = vmatpush3.msra.mxu0 %v400_v19  ;;  %924 = vmatpush3.msra.mxu1 %v494_v22 }
  0x22   : > { %892 = vmatprep.subr.mxu0 %v993_v1  ;;  %925 = vmatprep.subr.mxu1 %v993_v1 }
  0x23   : > { %893 = vmatpush3.msra.mxu0 %v399_v21  ;;  %926 = vmatpush3.msra.mxu1 %v493_v24 }
  0x24   : > { %894 = vmatprep.subr.mxu0 %v993_v1  ;;  %927 = vmatprep.subr.mxu1 %v993_v1 }
  0x25   : > { %895 = vmatpush3.msra.mxu0 %v398_v23  ;;  %928 = vmatpush3.msra.mxu1 %v492_v26 }
  0x26   : > { %896 = vmatprep.subr.mxu0 %v993_v1  ;;  %929 = vmatprep.subr.mxu1 %v993_v1 }
  0x27   : > { %897 = vmatpush3.msra.mxu0 %v397_v25  ;;  %930 = vmatpush3.msra.mxu1 %v491_v28 }
  0x28   : > { %898 = vmatprep.subr.mxu0 %v993_v1  ;;  %931 = vmatprep.subr.mxu1 %v993_v1 }
  0x29   : > { %899 = vmatpush3.msra.mxu0 %v396_v27  ;;  %932 = vmatpush3.msra.mxu1 %v490_v30 }
  0x2a   : > { %900 = vmatprep.subr.mxu0 %v993_v1  ;;  %933 = vmatprep.subr.mxu1 %v993_v1 }
  0x2b   : > { %901 = vmatpush3.msra.mxu0 %v395_v29  ;;  %934 = vmatpush3.msra.mxu1 %v489_v33 }
  0x2c   : > { %903 = vmatmul.mubr.f32.vlgmr.msra.gmra.mxu0 %v393_v31  ;;  %940 = vmatprep.subr.mxu0 %v993_v1 }
  0x2d   : > { %941 = vmatpush3.msra.mxu0 %v596_v32  ;;  %935 = vmatprep.subr.mxu1 %v993_v1 }
  0x2e   : > { %942 = vmatprep.subr.mxu0 %v993_v1  ;;  %936 = vmatpush3.msra.mxu1 %v488_v35 }
  0x2f   : > { %943 = vmatpush3.msra.mxu0 %v595_v34  ;;  %938 = vmatmul.mubr.f32.vlgmr.msra.gmra.mxu1 %v394_v37 }
  0x30   : > { %944 = vmatprep.subr.mxu0 %v993_v1  ;;  %972 = vmatprep.mubr.msk.f32.mxu0 %vm994_vm0, %v993_v1 }
  0x31   : > { %945 = vmatpush3.msra.mxu0 %v594_v36 }
  0x32   : > { %946 = vmatprep.subr.mxu0 %v993_v1 }
  0x33   : > { %947 = vmatpush3.msra.mxu0 %v593_v38 }
  0x34   : > { %948 = vmatprep.subr.mxu0 %v993_v1 }
  0x35   : > { %949 = vmatpush3.msra.mxu0 %v592_v39 }
  0x36   : > { %950 = vmatprep.subr.mxu0 %v993_v1 }
  0x37   : > { %951 = vmatpush3.msra.mxu0 %v591_v40 }
  0x38   : > { %952 = vmatprep.subr.mxu0 %v993_v1 }
  0x39   : > { %953 = vmatpush3.msra.mxu0 %v590_v41 }
  0x3a   : > { %954 = vmatprep.subr.mxu0 %v993_v1 }
  0x3b   : > { %955 = vmatpush3.msra.mxu0 %v589_v42 }
  0x3c   : > { %956 = vmatprep.subr.mxu0 %v993_v1 }
  0x3d   : > { %957 = vmatpush3.msra.mxu0 %v588_v43 }
  0x3e   : > { %958 = vmatprep.subr.mxu0 %v993_v1 }
  0x3f   : > { %959 = vmatpush3.msra.mxu0 %v587_v44 }
  0x40   : > { %960 = vmatprep.subr.mxu0 %v993_v1 }
  0x41   : > { %961 = vmatpush3.msra.mxu0 %v586_v45 }
  0x42   : > { %962 = vmatprep.subr.mxu0 %v993_v1 }
  0x43   : > { %963 = vmatpush3.msra.mxu0 %v585_v46 }
  0x44   : > { %964 = vmatprep.subr.mxu0 %v993_v1 }
  0x45   : > { %965 = vmatpush3.msra.mxu0 %v584_v47 }
  0x46   : > { %966 = vmatprep.subr.mxu0 %v993_v1 }
  0x47   : > { %967 = vmatpush3.msra.mxu0 %v583_v48 }
  0x48   : > { %968 = vmatprep.subr.mxu0 %v993_v1 }
  0x49   : > { %969 = vmatpush3.msra.mxu0 %v582_v49 }
  0x4a   : > { %970 = vmatprep.subr.mxu0 %v993_v1 }
  0x4b   : > { %971 = vmatpush3.msra.mxu0 %v581_v50 }
  0x4c   : > { %973 = vmatmul.mubr.f32.vlgmr.msra.gmra.mxu0 %v394_v37 }
  0xec   : > { %v484_v52 = vpop.f32.mrf.mxu0 }
  0xed   : > { %v485_v53 = vadd.f32 %v814_v51, %v484_v52 }
  0xee   : > { %v904_v54 = vpop.f32.mrf.mxu0 }
  0xef   : > { %674 = vst [vmem:[%s384_s14] sm:$0xff] %v485_v53  ;;  %v577_v56 = vpop.f32.mrf.mxu1 }
  0xf0   : > { %v578_v57 = vadd.f32 %v815_v55, %v577_v56 }
  0xf1   : > { %v939_v58 = vpop.f32.mrf.mxu1 }
  0xf2   : > { %675 = vst [vmem:[%s388_s18] sm:$0xff] %v578_v57 }
 0x10c   : > { %v670_v60 = vpop.f32.mrf.mxu0 }
 0x10d   : > { %v671_v61 = vadd.f32 %v816_v59, %v670_v60 }
 0x10e   : > { %v974_v62 = vpop.f32.mrf.mxu0 }
 0x10f   : > { %676 = vst [vmem:[%s392_s23] sm:$0xff] %v671_v61 }
 0x110 PF: > { %s21_s13 = sadd.s32 1, %s991_s13  }
 0x111   : > { %p18_p4 = scmp.ge.s32.totalorder %s21_s13, 4  }
 0x113   :  { %20 = sbr.rel (!%p18_p4) target bundleno = 1 (0x1), region = 109 }

</bundles_post_ra>
